<compile_context>
chip_gen: v6e
topology: v6e:2x2x1
jax: 0.10.0
libtpu: 0.0.40
codegen_flags: <defaults>
</compile_context>

<pallas_src>
import functools

import jax
import jax.numpy as jnp
import numpy as np
from jax import lax
from jax.experimental import pallas as pl
from jax.experimental.pallas import tpu as pltpu

EPS = 1e-5   # PyTorch BatchNorm2d default
KW = 9       # conv kernel width
PAD = 4      # conv padding along W


def basic_block_kernel(x_ref, gamma_ref, beta_ref, w_ref, b_ref, out_ref, *, width):
    """Fused BN(train) -> ReLU -> Conv2d(1xKW, pad (0,PAD)) -> concat([x, conv]).

    x_ref:     (N, C, HW)      f32
    gamma_ref: (C, 1)          f32
    beta_ref:  (C, 1)          f32
    w_ref:     (G, KW*C)       f32, w_ref[g, k*C + c] = weight[g, c, 0, k]
    b_ref:     (G, 1)          f32
    out_ref:   (N*(C+G), HW)   f32 -- per sample: rows [0:C] residual x, [C:C+G] conv.
    """
    x = x_ref[...]                                   # (N, C, HW), whole batch in regs
    N, C, HW = x.shape
    G = b_ref.shape[0]

    # ---- BatchNorm2d (training mode): batch statistics over (N, H, W), two-pass ----
    xs = [x[n] for n in range(N)]                    # list of (C, HW); N static
    cnt = jnp.float32(N * HW)
    mean = sum(jnp.sum(xn, axis=1, keepdims=True) for xn in xs) / cnt        # (C, 1)
    xcs = [xn - mean for xn in xs]
    var = sum(jnp.sum(xc * xc, axis=1, keepdims=True) for xc in xcs) / cnt   # (C, 1)
    inv = lax.rsqrt(var + EPS)                       # EUP slot, essentially free
    scale = gamma_ref[...] * inv                     # (C, 1)
    beta = beta_ref[...]                             # (C, 1)

    # ---- normalize + ReLU (per sample, rank-2) ----
    ys = [jnp.maximum(xc * scale + beta, 0.0) for xc in xcs]                 # (C, HW)

    # ---- Conv2d(C -> G, kernel (1, KW), stride 1, padding (0, PAD)) ----
    # Lane index is h*W + w; the kernel slides along w only, so tap k is a lane roll
    # plus a mask re-creating the zero padding at each W-row boundary.  Masks are
    # hoisted (shared across samples).
    w_coord = lax.broadcasted_iota(jnp.int32, (1, HW), 1) % width            # (1, HW)
    masks = []
    for k in range(KW):
        s = k - PAD
        if s == 0:
            masks.append(None)
        else:
            lo = max(0, -s)
            hi = min(width, width - s)
            masks.append((w_coord >= lo) & (w_coord < hi))

    w_flat = w_ref[...]                              # (G, KW*C)
    bias = b_ref[...]                                # (G, 1)

    out_rows = []
    for n in range(N):                               # N small & static: unrolled
        y_n = ys[n]                                  # (C, HW)
        taps = []
        for k in range(KW):
            s = k - PAD
            if s == 0:
                taps.append(y_n)
            else:
                rolled = pltpu.roll(y_n, (-s) % HW, axis=1)   # rolled[:, i] == y_n[:, i+s]
                taps.append(jnp.where(masks[k], rolled, 0.0))
        tap_stack = jnp.concatenate(taps, axis=0)    # (KW*C, HW), one stacked operand
        conv_n = jnp.dot(w_flat, tap_stack,
                         preferred_element_type=jnp.float32) + bias          # (G, HW)
        out_rows.append(xs[n])                       # residual channels pass through
        out_rows.append(conv_n)                      # new channels

    # Single store of the full, sublane-aligned (N*(C+G), HW) slab.
    out_ref[...] = jnp.concatenate(out_rows, axis=0)


def basic_block_forward(x_nchw, gamma, beta, weight, bias):
    """x_nchw: (N, C, H, W); weight: (G, C, 1, KW); returns (N, C+G, H, W)."""
    N, C, H, W = x_nchw.shape
    G = weight.shape[0]
    HW = H * W
    x_rows = x_nchw.reshape(N, C, HW)                # free reshape, layout unchanged

    # (G, C, 1, KW) -> (G, KW*C) with w_flat[g, k*C + c] = weight[g, c, 0, k]   (tiny)
    w_flat = jnp.transpose(weight[:, :, 0, :], (0, 2, 1)).reshape(G, KW * C)

    out = pl.pallas_call(
        functools.partial(basic_block_kernel, width=W),
        out_shape=jax.ShapeDtypeStruct((N * (C + G), HW), jnp.float32),
        grid=(1,),
        in_specs=[
            pl.BlockSpec((N, C, HW), lambda i: (0, 0, 0)),
            pl.BlockSpec((C, 1), lambda i: (0, 0)),
            pl.BlockSpec((C, 1), lambda i: (0, 0)),
            pl.BlockSpec((G, KW * C), lambda i: (0, 0)),
            pl.BlockSpec((G, 1), lambda i: (0, 0)),
        ],
        out_specs=pl.BlockSpec((N * (C + G), HW), lambda i: (0, 0)),
    )(x_rows, gamma.reshape(C, 1), beta.reshape(C, 1), w_flat, bias.reshape(G, 1))

    return out.reshape(N, C + G, H, W)               # free reshape back to NCHW


def ref_forward(x_nchw, gamma, beta, weight, bias):
    """Pure-JAX reference mirroring the PyTorch forward (training-mode BN)."""
    mean = x_nchw.mean(axis=(0, 2, 3), keepdims=True)
    var = ((x_nchw - mean) ** 2).mean(axis=(0, 2, 3), keepdims=True)
    y = (x_nchw - mean) / jnp.sqrt(var + EPS)
    y = y * gamma.reshape(1, -1, 1, 1) + beta.reshape(1, -1, 1, 1)
    y = jnp.maximum(y, 0.0)
    out = lax.conv_general_dilated(
        y, weight, window_strides=(1, 1), padding=((0, 0), (PAD, PAD)),
        dimension_numbers=("NCHW", "OIHW", "NCHW"),
    ) + bias.reshape(1, -1, 1, 1)
    return jnp.concatenate([x_nchw, out], axis=1)


if __name__ == "__main__":
    N, C, H, W, G = 2, 4, 8, 16, 8  # in_planes=4, grow_rate=8

    key = jax.random.PRNGKey(0)
    k1, k2, k3, k4, k5 = jax.random.split(key, 5)
    x = jax.random.normal(k1, (N, C, H, W), jnp.float32)
    gamma = 1.0 + 0.1 * jax.random.normal(k2, (C,), jnp.float32)
    beta = 0.1 * jax.random.normal(k3, (C,), jnp.float32)
    weight = 0.1 * jax.random.normal(k4, (G, C, 1, KW), jnp.float32)
    bias = 0.1 * jax.random.normal(k5, (G,), jnp.float32)

    fwd = jax.jit(basic_block_forward)
    out = jax.block_until_ready(fwd(x, gamma, beta, weight, bias))

    assert out.shape == (N, C + G, H, W), out.shape
    ref = ref_forward(x, gamma, beta, weight, bias)
    np.testing.assert_allclose(np.asarray(out), np.asarray(ref),
                               rtol=1e-4, atol=1e-4)
    print("KERNEL_OK")
</pallas_src>

<mosaic_0001>
module attributes {stable_mosaic.version = 11 : i64} {
  func.func @basic_block_kernel(%arg0: i32, %arg1: memref<2x4x128xf32, #tpu.memory_space<vmem>>, %arg2: memref<4x1xf32, #tpu.memory_space<vmem>>, %arg3: memref<4x1xf32, #tpu.memory_space<vmem>>, %arg4: memref<8x36xf32, #tpu.memory_space<vmem>>, %arg5: memref<8x1xf32, #tpu.memory_space<vmem>>, %arg6: memref<24x128xf32, #tpu.memory_space<vmem>>) attributes {dimension_semantics = [#tpu.dimension_semantics<arbitrary>], iteration_bounds = array<i64: 1>, scalar_prefetch = 0 : i64, scratch_operands = 0 : i64, tpu.core_type = #tpu.core_type<tc>, window_params = [{pipeline_mode = #tpu.pipeline_mode<synchronous>, transform_indices = @transform_0, window_bounds = array<i64: 2, 4, 128>}, {pipeline_mode = #tpu.pipeline_mode<synchronous>, transform_indices = @transform_1, window_bounds = array<i64: 4, 1>}, {pipeline_mode = #tpu.pipeline_mode<synchronous>, transform_indices = @transform_2, window_bounds = array<i64: 4, 1>}, {pipeline_mode = #tpu.pipeline_mode<synchronous>, transform_indices = @transform_3, window_bounds = array<i64: 8, 36>}, {pipeline_mode = #tpu.pipeline_mode<synchronous>, transform_indices = @transform_4, window_bounds = array<i64: 8, 1>}, {pipeline_mode = #tpu.pipeline_mode<synchronous>, transform_indices = @transform_5, window_bounds = array<i64: 24, 128>}]} {
    %c0 = arith.constant 0 : index
    %c0_0 = arith.constant 0 : index
    %c0_1 = arith.constant 0 : index
    %0 = vector.load %arg1[%c0, %c0_0, %c0_1] : memref<2x4x128xf32, #tpu.memory_space<vmem>>, vector<2x4x128xf32>
    %1 = vector.extract_strided_slice %0 {offsets = [0, 0, 0], sizes = [1, 4, 128], strides = [1, 1, 1]} : vector<2x4x128xf32> to vector<1x4x128xf32>
    %2 = vector.shape_cast %1 : vector<1x4x128xf32> to vector<4x128xf32>
    %3 = vector.extract_strided_slice %0 {offsets = [1, 0, 0], sizes = [1, 4, 128], strides = [1, 1, 1]} : vector<2x4x128xf32> to vector<1x4x128xf32>
    %4 = vector.shape_cast %3 : vector<1x4x128xf32> to vector<4x128xf32>
    %cst = arith.constant dense<0.000000e+00> : vector<4xf32>
    %5 = vector.multi_reduction <add>, %2, %cst [1] : vector<4x128xf32> to vector<4xf32>
    %6 = vector.shape_cast %5 : vector<4xf32> to vector<4x1xf32>
    %cst_2 = arith.constant 0.000000e+00 : f32
    %7 = vector.broadcast %cst_2 : f32 to vector<4x1xf32>
    %8 = arith.addf %7, %6 : vector<4x1xf32>
    %cst_3 = arith.constant dense<0.000000e+00> : vector<4xf32>
    %9 = vector.multi_reduction <add>, %4, %cst_3 [1] : vector<4x128xf32> to vector<4xf32>
    %10 = vector.shape_cast %9 : vector<4xf32> to vector<4x1xf32>
    %11 = arith.addf %8, %10 : vector<4x1xf32>
    %cst_4 = arith.constant 2.560000e+02 : f32
    %12 = vector.broadcast %cst_4 : f32 to vector<4x1xf32>
    %13 = arith.divf %11, %12 : vector<4x1xf32>
    %14 = vector.broadcast %13 : vector<4x1xf32> to vector<4x128xf32>
    %15 = arith.subf %2, %14 : vector<4x128xf32>
    %16 = vector.broadcast %13 : vector<4x1xf32> to vector<4x128xf32>
    %17 = arith.subf %4, %16 : vector<4x128xf32>
    %18 = arith.mulf %15, %15 : vector<4x128xf32>
    %cst_5 = arith.constant dense<0.000000e+00> : vector<4xf32>
    %19 = vector.multi_reduction <add>, %18, %cst_5 [1] : vector<4x128xf32> to vector<4xf32>
    %20 = vector.shape_cast %19 : vector<4xf32> to vector<4x1xf32>
    %cst_6 = arith.constant 0.000000e+00 : f32
    %21 = vector.broadcast %cst_6 : f32 to vector<4x1xf32>
    %22 = arith.addf %21, %20 : vector<4x1xf32>
    %23 = arith.mulf %17, %17 : vector<4x128xf32>
    %cst_7 = arith.constant dense<0.000000e+00> : vector<4xf32>
    %24 = vector.multi_reduction <add>, %23, %cst_7 [1] : vector<4x128xf32> to vector<4xf32>
    %25 = vector.shape_cast %24 : vector<4xf32> to vector<4x1xf32>
    %26 = arith.addf %22, %25 : vector<4x1xf32>
    %cst_8 = arith.constant 2.560000e+02 : f32
    %27 = vector.broadcast %cst_8 : f32 to vector<4x1xf32>
    %28 = arith.divf %26, %27 : vector<4x1xf32>
    %cst_9 = arith.constant 9.99999974E-6 : f32
    %29 = vector.broadcast %cst_9 : f32 to vector<4x1xf32>
    %30 = arith.addf %28, %29 : vector<4x1xf32>
    %31 = math.rsqrt %30 : vector<4x1xf32>
    %c0_10 = arith.constant 0 : index
    %c0_11 = arith.constant 0 : index
    %32 = vector.load %arg2[%c0_10, %c0_11] : memref<4x1xf32, #tpu.memory_space<vmem>>, vector<4x1xf32>
    %33 = arith.mulf %32, %31 : vector<4x1xf32>
    %c0_12 = arith.constant 0 : index
    %c0_13 = arith.constant 0 : index
    %34 = vector.load %arg3[%c0_12, %c0_13] : memref<4x1xf32, #tpu.memory_space<vmem>>, vector<4x1xf32>
    %35 = vector.broadcast %33 : vector<4x1xf32> to vector<4x128xf32>
    %36 = arith.mulf %15, %35 : vector<4x128xf32>
    %37 = vector.broadcast %34 : vector<4x1xf32> to vector<4x128xf32>
    %38 = arith.addf %36, %37 : vector<4x128xf32>
    %cst_14 = arith.constant 0.000000e+00 : f32
    %39 = vector.broadcast %cst_14 : f32 to vector<4x128xf32>
    %40 = arith.maximumf %38, %39 : vector<4x128xf32>
    %41 = vector.broadcast %33 : vector<4x1xf32> to vector<4x128xf32>
    %42 = arith.mulf %17, %41 : vector<4x128xf32>
    %43 = vector.broadcast %34 : vector<4x1xf32> to vector<4x128xf32>
    %44 = arith.addf %42, %43 : vector<4x128xf32>
    %cst_15 = arith.constant 0.000000e+00 : f32
    %45 = vector.broadcast %cst_15 : f32 to vector<4x128xf32>
    %46 = arith.maximumf %44, %45 : vector<4x128xf32>
    %47 = tpu.iota {dimensions = array<i32: 1>} : vector<1x128xi32>
    %c16_i32 = arith.constant 16 : i32
    %c0_i32 = arith.constant 0 : i32
    %48 = arith.cmpi eq, %c16_i32, %c0_i32 : i32
    %c1_i32 = arith.constant 1 : i32
    %49 = arith.select %48, %c1_i32, %c16_i32 : i32
    %50 = vector.broadcast %49 : i32 to vector<1x128xi32>
    %51 = arith.remsi %47, %50 : vector<1x128xi32>
    %c0_i32_16 = arith.constant 0 : i32
    %52 = vector.broadcast %c0_i32_16 : i32 to vector<1x128xi32>
    %53 = arith.cmpi ne, %51, %52 : vector<1x128xi32>
    %c0_i32_17 = arith.constant 0 : i32
    %54 = vector.broadcast %c0_i32_17 : i32 to vector<1x128xi32>
    %55 = arith.cmpi slt, %51, %54 : vector<1x128xi32>
    %c0_i32_18 = arith.constant 0 : i32
    %56 = arith.cmpi slt, %49, %c0_i32_18 : i32
    %57 = vector.broadcast %56 : i1 to vector<1x128xi1>
    %58 = vector.broadcast %57 : vector<1x128xi1> to vector<1x128xi1>
    %59 = arith.xori %55, %58 : vector<1x128xi1>
    %60 = arith.andi %59, %53 : vector<1x128xi1>
    %61 = vector.broadcast %49 : i32 to vector<1x128xi32>
    %62 = arith.addi %51, %61 : vector<1x128xi32>
    %63 = arith.select %60, %62, %51 : vector<1x128xi1>, vector<1x128xi32>
    %c4_i32 = arith.constant 4 : i32
    %64 = vector.broadcast %c4_i32 : i32 to vector<1x128xi32>
    %65 = arith.cmpi sge, %63, %64 : vector<1x128xi32>
    %c16_i32_19 = arith.constant 16 : i32
    %66 = vector.broadcast %c16_i32_19 : i32 to vector<1x128xi32>
    %67 = arith.cmpi slt, %63, %66 : vector<1x128xi32>
    %68 = arith.andi %65, %67 : vector<1x128xi1>
    %c3_i32 = arith.constant 3 : i32
    %69 = vector.broadcast %c3_i32 : i32 to vector<1x128xi32>
    %70 = arith.cmpi sge, %63, %69 : vector<1x128xi32>
    %c16_i32_20 = arith.constant 16 : i32
    %71 = vector.broadcast %c16_i32_20 : i32 to vector<1x128xi32>
    %72 = arith.cmpi slt, %63, %71 : vector<1x128xi32>
    %73 = arith.andi %70, %72 : vector<1x128xi1>
    %c2_i32 = arith.constant 2 : i32
    %74 = vector.broadcast %c2_i32 : i32 to vector<1x128xi32>
    %75 = arith.cmpi sge, %63, %74 : vector<1x128xi32>
    %c16_i32_21 = arith.constant 16 : i32
    %76 = vector.broadcast %c16_i32_21 : i32 to vector<1x128xi32>
    %77 = arith.cmpi slt, %63, %76 : vector<1x128xi32>
    %78 = arith.andi %75, %77 : vector<1x128xi1>
    %c1_i32_22 = arith.constant 1 : i32
    %79 = vector.broadcast %c1_i32_22 : i32 to vector<1x128xi32>
    %80 = arith.cmpi sge, %63, %79 : vector<1x128xi32>
    %c16_i32_23 = arith.constant 16 : i32
    %81 = vector.broadcast %c16_i32_23 : i32 to vector<1x128xi32>
    %82 = arith.cmpi slt, %63, %81 : vector<1x128xi32>
    %83 = arith.andi %80, %82 : vector<1x128xi1>
    %c0_i32_24 = arith.constant 0 : i32
    %84 = vector.broadcast %c0_i32_24 : i32 to vector<1x128xi32>
    %85 = arith.cmpi sge, %63, %84 : vector<1x128xi32>
    %c15_i32 = arith.constant 15 : i32
    %86 = vector.broadcast %c15_i32 : i32 to vector<1x128xi32>
    %87 = arith.cmpi slt, %63, %86 : vector<1x128xi32>
    %88 = arith.andi %85, %87 : vector<1x128xi1>
    %c0_i32_25 = arith.constant 0 : i32
    %89 = vector.broadcast %c0_i32_25 : i32 to vector<1x128xi32>
    %90 = arith.cmpi sge, %63, %89 : vector<1x128xi32>
    %c14_i32 = arith.constant 14 : i32
    %91 = vector.broadcast %c14_i32 : i32 to vector<1x128xi32>
    %92 = arith.cmpi slt, %63, %91 : vector<1x128xi32>
    %93 = arith.andi %90, %92 : vector<1x128xi1>
    %c0_i32_26 = arith.constant 0 : i32
    %94 = vector.broadcast %c0_i32_26 : i32 to vector<1x128xi32>
    %95 = arith.cmpi sge, %63, %94 : vector<1x128xi32>
    %c13_i32 = arith.constant 13 : i32
    %96 = vector.broadcast %c13_i32 : i32 to vector<1x128xi32>
    %97 = arith.cmpi slt, %63, %96 : vector<1x128xi32>
    %98 = arith.andi %95, %97 : vector<1x128xi1>
    %c0_i32_27 = arith.constant 0 : i32
    %99 = vector.broadcast %c0_i32_27 : i32 to vector<1x128xi32>
    %100 = arith.cmpi sge, %63, %99 : vector<1x128xi32>
    %c12_i32 = arith.constant 12 : i32
    %101 = vector.broadcast %c12_i32 : i32 to vector<1x128xi32>
    %102 = arith.cmpi slt, %63, %101 : vector<1x128xi32>
    %103 = arith.andi %100, %102 : vector<1x128xi1>
    %c0_28 = arith.constant 0 : index
    %c0_29 = arith.constant 0 : index
    %104 = vector.load %arg4[%c0_28, %c0_29] : memref<8x36xf32, #tpu.memory_space<vmem>>, vector<8x36xf32>
    %c0_30 = arith.constant 0 : index
    %c0_31 = arith.constant 0 : index
    %105 = vector.load %arg5[%c0_30, %c0_31] : memref<8x1xf32, #tpu.memory_space<vmem>>, vector<8x1xf32>
    %c4_i32_32 = arith.constant 4 : i32
    %106 = tpu.dynamic_rotate %40 by %c4_i32_32 dim 1 : vector<4x128xf32>, i32 -> vector<4x128xf32>
    %cst_33 = arith.constant 0.000000e+00 : f32
    %107 = vector.shape_cast %68 : vector<1x128xi1> to vector<1x128xi1>
    %108 = vector.broadcast %107 : vector<1x128xi1> to vector<4x128xi1>
    %109 = vector.broadcast %cst_33 : f32 to vector<4x128xf32>
    %110 = arith.select %108, %106, %109 : vector<4x128xi1>, vector<4x128xf32>
    %c3_i32_34 = arith.constant 3 : i32
    %111 = tpu.dynamic_rotate %40 by %c3_i32_34 dim 1 : vector<4x128xf32>, i32 -> vector<4x128xf32>
    %cst_35 = arith.constant 0.000000e+00 : f32
    %112 = vector.shape_cast %73 : vector<1x128xi1> to vector<1x128xi1>
    %113 = vector.broadcast %112 : vector<1x128xi1> to vector<4x128xi1>
    %114 = vector.broadcast %cst_35 : f32 to vector<4x128xf32>
    %115 = arith.select %113, %111, %114 : vector<4x128xi1>, vector<4x128xf32>
    %c2_i32_36 = arith.constant 2 : i32
    %116 = tpu.dynamic_rotate %40 by %c2_i32_36 dim 1 : vector<4x128xf32>, i32 -> vector<4x128xf32>
    %cst_37 = arith.constant 0.000000e+00 : f32
    %117 = vector.shape_cast %78 : vector<1x128xi1> to vector<1x128xi1>
    %118 = vector.broadcast %117 : vector<1x128xi1> to vector<4x128xi1>
    %119 = vector.broadcast %cst_37 : f32 to vector<4x128xf32>
    %120 = arith.select %118, %116, %119 : vector<4x128xi1>, vector<4x128xf32>
    %c1_i32_38 = arith.constant 1 : i32
    %121 = tpu.dynamic_rotate %40 by %c1_i32_38 dim 1 : vector<4x128xf32>, i32 -> vector<4x128xf32>
    %cst_39 = arith.constant 0.000000e+00 : f32
    %122 = vector.shape_cast %83 : vector<1x128xi1> to vector<1x128xi1>
    %123 = vector.broadcast %122 : vector<1x128xi1> to vector<4x128xi1>
    %124 = vector.broadcast %cst_39 : f32 to vector<4x128xf32>
    %125 = arith.select %123, %121, %124 : vector<4x128xi1>, vector<4x128xf32>
    %c127_i32 = arith.constant 127 : i32
    %126 = tpu.dynamic_rotate %40 by %c127_i32 dim 1 : vector<4x128xf32>, i32 -> vector<4x128xf32>
    %cst_40 = arith.constant 0.000000e+00 : f32
    %127 = vector.shape_cast %88 : vector<1x128xi1> to vector<1x128xi1>
    %128 = vector.broadcast %127 : vector<1x128xi1> to vector<4x128xi1>
    %129 = vector.broadcast %cst_40 : f32 to vector<4x128xf32>
    %130 = arith.select %128, %126, %129 : vector<4x128xi1>, vector<4x128xf32>
    %c126_i32 = arith.constant 126 : i32
    %131 = tpu.dynamic_rotate %40 by %c126_i32 dim 1 : vector<4x128xf32>, i32 -> vector<4x128xf32>
    %cst_41 = arith.constant 0.000000e+00 : f32
    %132 = vector.shape_cast %93 : vector<1x128xi1> to vector<1x128xi1>
    %133 = vector.broadcast %132 : vector<1x128xi1> to vector<4x128xi1>
    %134 = vector.broadcast %cst_41 : f32 to vector<4x128xf32>
    %135 = arith.select %133, %131, %134 : vector<4x128xi1>, vector<4x128xf32>
    %c125_i32 = arith.constant 125 : i32
    %136 = tpu.dynamic_rotate %40 by %c125_i32 dim 1 : vector<4x128xf32>, i32 -> vector<4x128xf32>
    %cst_42 = arith.constant 0.000000e+00 : f32
    %137 = vector.shape_cast %98 : vector<1x128xi1> to vector<1x128xi1>
    %138 = vector.broadcast %137 : vector<1x128xi1> to vector<4x128xi1>
    %139 = vector.broadcast %cst_42 : f32 to vector<4x128xf32>
    %140 = arith.select %138, %136, %139 : vector<4x128xi1>, vector<4x128xf32>
    %c124_i32 = arith.constant 124 : i32
    %141 = tpu.dynamic_rotate %40 by %c124_i32 dim 1 : vector<4x128xf32>, i32 -> vector<4x128xf32>
    %cst_43 = arith.constant 0.000000e+00 : f32
    %142 = vector.shape_cast %103 : vector<1x128xi1> to vector<1x128xi1>
    %143 = vector.broadcast %142 : vector<1x128xi1> to vector<4x128xi1>
    %144 = vector.broadcast %cst_43 : f32 to vector<4x128xf32>
    %145 = arith.select %143, %141, %144 : vector<4x128xi1>, vector<4x128xf32>
    %146 = tpu.concatenate %110, %115, %120, %125, %40, %130, %135, %140, %145 in 0 : vector<4x128xf32>, vector<4x128xf32>, vector<4x128xf32>, vector<4x128xf32>, vector<4x128xf32>, vector<4x128xf32>, vector<4x128xf32>, vector<4x128xf32>, vector<4x128xf32> -> vector<36x128xf32>
    %cst_44 = arith.constant dense<0.000000e+00> : vector<8x128xf32>
    %147 = tpu.matmul %104, %146, %cst_44 {dimension_numbers = #tpu.dot_dimension_numbers<[1], [0], [0], [1], [0, 0, 1, 1], [], []>} : vector<8x36xf32>, vector<36x128xf32>, vector<8x128xf32> -> vector<8x128xf32>
    %148 = vector.broadcast %105 : vector<8x1xf32> to vector<8x128xf32>
    %149 = arith.addf %147, %148 : vector<8x128xf32>
    %c4_i32_45 = arith.constant 4 : i32
    %150 = tpu.dynamic_rotate %46 by %c4_i32_45 dim 1 : vector<4x128xf32>, i32 -> vector<4x128xf32>
    %cst_46 = arith.constant 0.000000e+00 : f32
    %151 = vector.shape_cast %68 : vector<1x128xi1> to vector<1x128xi1>
    %152 = vector.broadcast %151 : vector<1x128xi1> to vector<4x128xi1>
    %153 = vector.broadcast %cst_46 : f32 to vector<4x128xf32>
    %154 = arith.select %152, %150, %153 : vector<4x128xi1>, vector<4x128xf32>
    %c3_i32_47 = arith.constant 3 : i32
    %155 = tpu.dynamic_rotate %46 by %c3_i32_47 dim 1 : vector<4x128xf32>, i32 -> vector<4x128xf32>
    %cst_48 = arith.constant 0.000000e+00 : f32
    %156 = vector.shape_cast %73 : vector<1x128xi1> to vector<1x128xi1>
    %157 = vector.broadcast %156 : vector<1x128xi1> to vector<4x128xi1>
    %158 = vector.broadcast %cst_48 : f32 to vector<4x128xf32>
    %159 = arith.select %157, %155, %158 : vector<4x128xi1>, vector<4x128xf32>
    %c2_i32_49 = arith.constant 2 : i32
    %160 = tpu.dynamic_rotate %46 by %c2_i32_49 dim 1 : vector<4x128xf32>, i32 -> vector<4x128xf32>
    %cst_50 = arith.constant 0.000000e+00 : f32
    %161 = vector.shape_cast %78 : vector<1x128xi1> to vector<1x128xi1>
    %162 = vector.broadcast %161 : vector<1x128xi1> to vector<4x128xi1>
    %163 = vector.broadcast %cst_50 : f32 to vector<4x128xf32>
    %164 = arith.select %162, %160, %163 : vector<4x128xi1>, vector<4x128xf32>
    %c1_i32_51 = arith.constant 1 : i32
    %165 = tpu.dynamic_rotate %46 by %c1_i32_51 dim 1 : vector<4x128xf32>, i32 -> vector<4x128xf32>
    %cst_52 = arith.constant 0.000000e+00 : f32
    %166 = vector.shape_cast %83 : vector<1x128xi1> to vector<1x128xi1>
    %167 = vector.broadcast %166 : vector<1x128xi1> to vector<4x128xi1>
    %168 = vector.broadcast %cst_52 : f32 to vector<4x128xf32>
    %169 = arith.select %167, %165, %168 : vector<4x128xi1>, vector<4x128xf32>
    %c127_i32_53 = arith.constant 127 : i32
    %170 = tpu.dynamic_rotate %46 by %c127_i32_53 dim 1 : vector<4x128xf32>, i32 -> vector<4x128xf32>
    %cst_54 = arith.constant 0.000000e+00 : f32
    %171 = vector.shape_cast %88 : vector<1x128xi1> to vector<1x128xi1>
    %172 = vector.broadcast %171 : vector<1x128xi1> to vector<4x128xi1>
    %173 = vector.broadcast %cst_54 : f32 to vector<4x128xf32>
    %174 = arith.select %172, %170, %173 : vector<4x128xi1>, vector<4x128xf32>
    %c126_i32_55 = arith.constant 126 : i32
    %175 = tpu.dynamic_rotate %46 by %c126_i32_55 dim 1 : vector<4x128xf32>, i32 -> vector<4x128xf32>
    %cst_56 = arith.constant 0.000000e+00 : f32
    %176 = vector.shape_cast %93 : vector<1x128xi1> to vector<1x128xi1>
    %177 = vector.broadcast %176 : vector<1x128xi1> to vector<4x128xi1>
    %178 = vector.broadcast %cst_56 : f32 to vector<4x128xf32>
    %179 = arith.select %177, %175, %178 : vector<4x128xi1>, vector<4x128xf32>
    %c125_i32_57 = arith.constant 125 : i32
    %180 = tpu.dynamic_rotate %46 by %c125_i32_57 dim 1 : vector<4x128xf32>, i32 -> vector<4x128xf32>
    %cst_58 = arith.constant 0.000000e+00 : f32
    %181 = vector.shape_cast %98 : vector<1x128xi1> to vector<1x128xi1>
    %182 = vector.broadcast %181 : vector<1x128xi1> to vector<4x128xi1>
    %183 = vector.broadcast %cst_58 : f32 to vector<4x128xf32>
    %184 = arith.select %182, %180, %183 : vector<4x128xi1>, vector<4x128xf32>
    %c124_i32_59 = arith.constant 124 : i32
    %185 = tpu.dynamic_rotate %46 by %c124_i32_59 dim 1 : vector<4x128xf32>, i32 -> vector<4x128xf32>
    %cst_60 = arith.constant 0.000000e+00 : f32
    %186 = vector.shape_cast %103 : vector<1x128xi1> to vector<1x128xi1>
    %187 = vector.broadcast %186 : vector<1x128xi1> to vector<4x128xi1>
    %188 = vector.broadcast %cst_60 : f32 to vector<4x128xf32>
    %189 = arith.select %187, %185, %188 : vector<4x128xi1>, vector<4x128xf32>
    %190 = tpu.concatenate %154, %159, %164, %169, %46, %174, %179, %184, %189 in 0 : vector<4x128xf32>, vector<4x128xf32>, vector<4x128xf32>, vector<4x128xf32>, vector<4x128xf32>, vector<4x128xf32>, vector<4x128xf32>, vector<4x128xf32>, vector<4x128xf32> -> vector<36x128xf32>
    %cst_61 = arith.constant dense<0.000000e+00> : vector<8x128xf32>
    %191 = tpu.matmul %104, %190, %cst_61 {dimension_numbers = #tpu.dot_dimension_numbers<[1], [0], [0], [1], [0, 0, 1, 1], [], []>} : vector<8x36xf32>, vector<36x128xf32>, vector<8x128xf32> -> vector<8x128xf32>
    %192 = vector.broadcast %105 : vector<8x1xf32> to vector<8x128xf32>
    %193 = arith.addf %191, %192 : vector<8x128xf32>
    %194 = tpu.concatenate %2, %149, %4, %193 in 0 : vector<4x128xf32>, vector<8x128xf32>, vector<4x128xf32>, vector<8x128xf32> -> vector<24x128xf32>
    %c0_62 = arith.constant 0 : index
    %c0_63 = arith.constant 0 : index
    %195 = vector.load %arg6[%c0_62, %c0_63] : memref<24x128xf32, #tpu.memory_space<vmem>>, vector<24x128xf32>
    tpu.vector_store %arg6[%c0_62, %c0_63], %194 {strides = array<i32>} : memref<24x128xf32, #tpu.memory_space<vmem>>, vector<24x128xf32>,
    return
  }
  func.func @transform_0(%arg0: i32) -> (i32, i32, i32) {
    %c0_i32 = arith.constant 0 : i32
    %c0_i32_0 = arith.constant 0 : i32
    %c0_i32_1 = arith.constant 0 : i32
    %c0_i32_2 = arith.constant 0 : i32
    return %c0_i32, %c0_i32_0, %c0_i32_1 : i32, i32, i32
  }
  func.func @transform_1(%arg0: i32) -> (i32, i32) {
    %c0_i32 = arith.constant 0 : i32
    %c0_i32_0 = arith.constant 0 : i32
    %c0_i32_1 = arith.constant 0 : i32
    return %c0_i32, %c0_i32_0 : i32, i32
  }
  func.func @transform_2(%arg0: i32) -> (i32, i32) {
    %c0_i32 = arith.constant 0 : i32
    %c0_i32_0 = arith.constant 0 : i32
    %c0_i32_1 = arith.constant 0 : i32
    return %c0_i32, %c0_i32_0 : i32, i32
  }
  func.func @transform_3(%arg0: i32) -> (i32, i32) {
    %c0_i32 = arith.constant 0 : i32
    %c0_i32_0 = arith.constant 0 : i32
    %c0_i32_1 = arith.constant 0 : i32
    return %c0_i32, %c0_i32_0 : i32, i32
  }
  func.func @transform_4(%arg0: i32) -> (i32, i32) {
    %c0_i32 = arith.constant 0 : i32
    %c0_i32_0 = arith.constant 0 : i32
    %c0_i32_1 = arith.constant 0 : i32
    return %c0_i32, %c0_i32_0 : i32, i32
  }
  func.func @transform_5(%arg0: i32) -> (i32, i32) {
    %c0_i32 = arith.constant 0 : i32
    %c0_i32_0 = arith.constant 0 : i32
    %c0_i32_1 = arith.constant 0 : i32
    return %c0_i32, %c0_i32_0 : i32, i32
  }
}

</mosaic_0001>

<bundles_post_ra>
// kernel: basic_block_forward.1
= control target key start
LH: loop header
LB: loop body
LE: loop exit
PB: predicated region body
PF: predicated region fallthrough
CT: control target
= control target key end

     0   :  { %vm22_vm0 = vcmask 1043456   ;;  %v424_v14 = vmov 0   ;;  %v425_v24 = vmov 0.0   ;;  %s428_s25 = smov 124   ;;  %s429_s26 = smov 3   ;;  %vm433_vm1 = vmmov 0   ;;  %s581_s0 = inlined_call_operand.vmem [shape: f32[2,4,128], index: 0, kind: input, shape index: {}]   ;;  %s582_s2 = inlined_call_operand.vmem [shape: f32[4,1], index: 2, kind: input, shape index: {}]   ;;  %s583_s1 = inlined_call_operand.vmem [shape: f32[4,1], index: 1, kind: input, shape index: {}]   ;;  %s584_s4 = inlined_call_operand.vmem [shape: f32[8,1], index: 4, kind: input, shape index: {}]   ;;  %s585_s3 = inlined_call_operand.vmem [shape: f32[8,36], index: 3, kind: input, shape index: {}]   ;;  %s586_s5 = inlined_call_operand.vmem [shape: f32[24,128], index: 5, kind: output, shape index: {}]  }
   0x1   :  { %v468_v0 = vld [vmem:[%s581_s0] sm:$0xf]  ;;  %v473_v1 = vld [vmem:[%s581_s0 + $0x4] sm:$0xf]  ;;  %420 = vset.pattern.permute.xlu0 %v424_v14  ;;  %421 = vset.pattern.permute.xlu1 %v424_v14  ;;  %s430_s27 = smov 1   ;;  %s431_s28 = smov 126   ;;  %v67_v34 = vlaneseq }
   0x2   :  { %v23_v2 = vsel %vm22_vm0, %v468_v0, 0.0  ;;  %v27_v3 = vsel %vm22_vm0, %v473_v1, 0.0  ;;  %v50_v15 = vld [vmem:[%s582_s2] sm:$0xf]  ;;  %383 = vmatprep.subr.mxu0 %v425_v24  ;;  %396 = vmatprep.subr.mxu1 %v425_v24  ;;  %s426_s2 = smov 125   ;;  %s432_s29 = smov 4  }
   0x3   :  { %24 = vadd.xlane.f32.xlu0 %v23_v2  ;;  %v48_v21 = vld [vmem:[%s583_s1] sm:$0xf]  ;;  %s427_s1 = smov 127   ;;  %393 = vmatprep.mubr.msk.f32.mxu0 %vm433_vm1, %v425_v24  ;;  %s434_s30 = smov 2   ;;  %v68_v35 = vand.u32 127, %v67_v34  ;;  %vm162_vm10 = vcmask 293888  }
   0x4   :  { %406 = vmatprep.mubr.msk.f32.mxu1 %vm433_vm1, %v425_v24  ;;  %v100_v33 = vld [vmem:[%s584_s4] sm:$0xff] }
   0x5   :  { %v506_v36 = vand.u32 15, %v68_v35 }
   0x7   :  { %28 = vadd.xlane.f32.xlu0 %v27_v3  ;;  %vm97_vm2 = vcmp.lt.s32.totalorder %v506_v36, 12  ;;  %vm95_vm3 = vcmp.lt.s32.totalorder %v506_v36, 13  ;;  %vm91_vm4 = vcmp.lt.s32.totalorder %v506_v36, 15  ;;  %vm93_vm5 = vcmp.lt.s32.totalorder %v506_v36, 14 }
   0x8   :  { %vm88_vm6 = vcmp.ge.s32.totalorder %v506_v36, 1  ;;  %vm84_vm7 = vcmp.ge.s32.totalorder %v506_v36, 3  ;;  %vm86_vm8 = vcmp.ge.s32.totalorder %v506_v36, 2  ;;  %vm81_vm9 = vcmp.ge.s32.totalorder %v506_v36, 4 }
  0x8c   :  { %v25_v4 = vpop.xlane.xlu0 %24 }
  0x90   :  { %v29_v5 = vpop.xlane.xlu0 %28 }
  0x91   :  { %v30_v6 = vadd.f32 %v29_v5, %v25_v4 }
  0x93   :  { %v32_v7 = vmul.f32 0.00390625, %v30_v6 }
  0x95   :  { %v33_v8 = vsub.f32 %v468_v0, %v32_v7  ;;  %v34_v9 = vsub.f32 %v473_v1, %v32_v7 }
  0x97   :  { %v35_v10 = vmul.f32 %v33_v8, %v33_v8  ;;  %v40_v12 = vmul.f32 %v34_v9, %v34_v9 }
  0x99   :  { %v36_v11 = vsel %vm22_vm0, %v35_v10, 0.0  ;;  %v41_v13 = vsel %vm22_vm0, %v40_v12, 0.0 }
  0x9a   :  { %37 = vadd.xlane.f32.xlu1 %v36_v11 }
  0x9e   :  { %42 = vadd.xlane.f32.xlu1 %v41_v13  ;;  %v99_v13 = vld [vmem:[%s585_s3] sm:$0xff] }
  0xaf   :  { %59 = vperm.xlu1 %421, %v50_v15  }
 0x123   :  { %v38_v16 = vpop.xlane.xlu1 %37 }
 0x127   :  { %v43_v17 = vpop.xlane.xlu1 %42 }
 0x128   :  { %v44_v18 = vadd.f32 %v43_v17, %v38_v16 }
 0x12a   :  { %v45_v19 = vmul.f32 0.00390625, %v44_v18 }
 0x12b   :  { %v60_v26 = vpop.permute.xlu1 %59 }
 0x12c   :  { %v46_v20 = vadd.f32 1e-05, %v45_v19 }
 0x12e   :  { %422 = vrsqrt.f32 %v46_v20 }
 0x13b   :  { %v423_v22 = vpop.eup %422 }
 0x13c   :  { %v49_v23 = vmul.f32 %v423_v22, %v48_v21 }
 0x13e   :  { %53 = vperm.xlu0 %420, %v49_v23  }
 0x1b9   :  { %v54_v25 = vpop.permute.xlu0 %53 }
 0x1ba   :  { %v56_v27 = vmul.f32 %v54_v25, %v33_v8  ;;  %v64_v28 = vmul.f32 %v54_v25, %v34_v9 }
 0x1bc   :  { %v62_v29 = vadd.f32 %v60_v26, %v56_v27  ;;  %v65_v30 = vadd.f32 %v64_v28, %v60_v26  ;;  %v356_v27 = vrot.slane %v473_v1, 4 }
 0x1be   :  { %v63_v31 = vmax.f32 %v62_v29, 0.0  ;;  %v491_v32 = vmax.f32 %v65_v30, 0.0 }
 0x1c0   :  { %131 = vrot.lane.b32.xlu1 %v63_v31, %s426_s2  ;;  %251 = vrot.lane.b32.xlu0 %v491_v32, %s427_s1 }
 0x1c4   :  { %136 = vrot.lane.b32.xlu1 %v63_v31, %s428_s25  ;;  %106 = vrot.lane.b32.xlu0 %v63_v31, %s429_s26 }
 0x1c8   :  { %121 = vrot.lane.b32.xlu1 %v63_v31, %s427_s1  ;;  %248 = vrot.lane.b32.xlu0 %v491_v32, %s430_s27 }
 0x1cc   :  { %126 = vrot.lane.b32.xlu1 %v63_v31, %s431_s28  ;;  %242 = vrot.lane.b32.xlu0 %v491_v32, %s429_s26 }
 0x1d0   :  { %239 = vrot.lane.b32.xlu0 %v491_v32, %s432_s29  ;;  %257 = vrot.lane.b32.xlu1 %v491_v32, %s426_s2 }
 0x1d4   :  { %116 = vrot.lane.b32.xlu1 %v63_v31, %s430_s27 }
 0x1d8   :  { %260 = vrot.lane.b32.xlu1 %v491_v32, %s428_s25 }
 0x1dc   :  { %254 = vrot.lane.b32.xlu1 %v491_v32, %s431_s28 }
 0x1e0   :  { %111 = vrot.lane.b32.xlu1 %v63_v31, %s434_s30 }
 0x1e4   :  { %101 = vrot.lane.b32.xlu1 %v63_v31, %s432_s29 }
 0x1e8   :  { %245 = vrot.lane.b32.xlu1 %v491_v32, %s434_s30 }
 0x1ec   :  { %159 = vperm.xlu1 %421, %v100_v33  }
 0x232   :  { %v132_v37 = vpop.permute.xlu1 %131  ;;  %v252_v47 = vpop.permute.xlu0 %251 }
 0x233   :  { %v135_v41 = vsel %vm95_vm3, %v132_v37, 0.0  ;;  %v253_v54 = vsel %vm91_vm4, %v252_v47, 0.0 }
 0x234   :  { %v151_v43 = vrot.slane %v135_v41, 4  ;;  %v270_v58 = vrot.slane %v253_v54, 4 }
 0x236   :  { %v137_v38 = vpop.permute.xlu1 %136  ;;  %v107_v51 = vpop.permute.xlu0 %106  ;;  %v277_v5 = vsel %vm22_vm0, %v491_v32, %v270_v58 }
 0x237   :  { %v140_v39 = vsel %vm97_vm2, %v137_v38, 0.0  ;;  %v110_v6 = vsel %vm84_vm7, %v107_v51, 0.0 }
 0x238   :  { %384 = vmatpush3.msk.msra.mxu0 %vm22_vm0, %v140_v39  ;;  %v142_v9 = vrot.slane %v110_v6, 4 }
 0x239   :  { %385 = vmatprep.subr.mxu0 %v425_v24 }
 0x23a   :  { %v122_v40 = vpop.permute.xlu1 %121  ;;  %v249_v57 = vpop.permute.xlu0 %248 }
 0x23b   :  { %v125_v42 = vsel %vm91_vm4, %v122_v40, 0.0  ;;  %v250_v11 = vsel %vm88_vm6, %v249_v57, 0.0 }
 0x23c   :  { %v148_v44 = vrot.slane %v125_v42, 4  ;;  %v267_v17 = vrot.slane %v250_v11, 4 }
 0x23e   :  { %v127_v45 = vpop.permute.xlu1 %126  ;;  %v155_v50 = vsel %vm22_vm0, %v63_v31, %v148_v44  ;;  %v243_v2 = vpop.permute.xlu0 %242 }
 0x23f   :  { %v130_v46 = vsel %vm93_vm5, %v127_v45, 0.0  ;;  %v244_v16 = vsel %vm84_vm7, %v243_v2, 0.0 }
 0x240   :  { %v156_v48 = vsel %vm22_vm0, %v130_v46, %v151_v43  ;;  %v264_v21 = vrot.slane %v244_v16, 4 }
 0x241   :  { %386 = vmatpush3.msra.mxu0 %v156_v48 }
 0x242   :  { %387 = vmatprep.subr.mxu0 %v425_v24  ;;  %v258_v49 = vpop.permute.xlu1 %257  ;;  %v240_v14 = vpop.permute.xlu0 %239 }
 0x243   :  { %388 = vmatpush3.msra.mxu0 %v155_v50  ;;  %v259_v55 = vsel %vm95_vm3, %v258_v49, 0.0  ;;  %v241_v19 = vsel %vm81_vm9, %v240_v14, 0.0 }
 0x244   :  { %389 = vmatprep.subr.mxu0 %v425_v24  ;;  %v273_v59 = vrot.slane %v259_v55, 4  ;;  %v275_v23 = vsel %vm22_vm0, %v241_v19, %v264_v21 }
 0x246   :  { %v117_v52 = vpop.permute.xlu1 %116 }
 0x247   :  { %v120_v61 = vsel %vm88_vm6, %v117_v52, 0.0 }
 0x248   :  { %v145_v3 = vrot.slane %v120_v61, 4 }
 0x24a   :  { %v261_v53 = vpop.permute.xlu1 %260 }
 0x24b   :  { %v262_v56 = vsel %vm97_vm2, %v261_v53, 0.0 }
 0x24c   :  { %397 = vmatpush3.msk.msra.mxu1 %vm22_vm0, %v262_v56 }
 0x24d   :  { %398 = vmatprep.subr.mxu1 %v425_v24 }
 0x24e   :  { %v255_v60 = vpop.permute.xlu1 %254 }
 0x24f   :  { %v256_v62 = vsel %vm93_vm5, %v255_v60, 0.0 }
 0x250   :  { %v278_v63 = vsel %vm22_vm0, %v256_v62, %v273_v59 }
 0x251   :  { %399 = vmatpush3.msra.mxu1 %v278_v63 }
 0x252   :  { %400 = vmatprep.subr.mxu1 %v425_v24  ;;  %v112_v4 = vpop.permute.xlu1 %111 }
 0x253   :  { %v115_v7 = vsel %vm86_vm8, %v112_v4, 0.0  ;;  %401 = vmatpush3.msra.mxu1 %v277_v5 }
 0x254   :  { %v154_v8 = vsel %vm22_vm0, %v115_v7, %v145_v3  ;;  %402 = vmatprep.subr.mxu1 %v425_v24 }
 0x255   :  { %390 = vmatpush3.msra.mxu0 %v154_v8 }
 0x256   :  { %v102_v10 = vpop.permute.xlu1 %101  ;;  %391 = vmatprep.subr.mxu0 %v425_v24 }
 0x257   :  { %v105_v12 = vsel %vm81_vm9, %v102_v10, 0.0 }
 0x258   :  { %v153_v15 = vsel %vm22_vm0, %v105_v12, %v142_v9 }
 0x259   :  { %392 = vmatpush3.msra.mxu0 %v153_v15 }
 0x25a   :  { %394 = vmatmul.mubr.msk.f32.vlgmr.msra.gmra.mxu0 %vm162_vm10, %v99_v13  ;;  %v246_v18 = vpop.permute.xlu1 %245 }
 0x25b   :  { %v247_v20 = vsel %vm86_vm8, %v246_v18, 0.0 }
 0x25c   :  { %v276_v22 = vsel %vm22_vm0, %v247_v20, %v267_v17 }
 0x25d   :  { %403 = vmatpush3.msra.mxu1 %v276_v22 }
 0x25e   :  { %404 = vmatprep.subr.mxu1 %v425_v24 }
 0x25f   :  { %405 = vmatpush3.msra.mxu1 %v275_v23 }
 0x260   :  { %407 = vmatmul.mubr.msk.f32.vlgmr.msra.gmra.mxu1 %vm162_vm10, %v99_v13 }
 0x267   :  { %v160_v25 = vpop.permute.xlu1 %159 }
 0x31a   :  { %v235_v26 = vpop.f32.mrf.mxu0 }
 0x31b   :  { %v236_v28 = vadd.f32 %v235_v26, %v160_v25 }
 0x31c   :  { %v395_v29 = vpop.f32.mrf.mxu0 }
 0x31d   :  { %v353_v30 = vrot.slane %v236_v28, 4 }
 0x31f   :  { %v358_v31 = vsel %vm22_vm0, %v468_v0, %v353_v30  ;;  %v359_v32 = vsel %vm22_vm0, %v353_v30, %v356_v27 }
 0x320   :  { %v348_v33 = vpop.f32.mrf.mxu1  ;;  %360 = vst [vmem:[%s586_s5] sm:$0xff] %v358_v31  ;;  %361 = vst [vmem:[%s586_s5 + $0x8] sm:$0xff] %v359_v32 }
 0x321   :  { %v349_v24 = vadd.f32 %v348_v33, %v160_v25 }
 0x322   :  { %v408_v34 = vpop.f32.mrf.mxu1 }
 0x323   :  { %362 = vst [vmem:[%s586_s5 + $0x10] sm:$0xff] %v349_v24 }

</bundles_post_ra>
